<compile_context>
chip_gen: v6e
topology: v6e:2x2x1
jax: 0.10.0
libtpu: 0.0.40
codegen_flags: <defaults>
</compile_context>

<pallas_src>
import functools

import jax
import jax.numpy as jnp
from jax import lax
from jax.experimental import pallas as pl
from jax.experimental.pallas import tpu as pltpu


def _lane_roll(x, shift):
    """Roll along the last (lane) axis by a static shift (0 == identity)."""
    return x if shift == 0 else pltpu.roll(x, shift, axis=1)


def _shift_channel_mix_kernel(x_ref, o_ref, *, W, HW, shift_h, shift_w,
                              chunk_rows):
    # x_ref / o_ref: (tc, H*W) lane-dense tile of one channel-group chunk.
    g = pl.program_id(1)                       # which of the 4 channel groups
    tc = x_ref.shape[0]
    nchunks = tc // chunk_rows                 # static; chunk_rows divides tc

    # Flat-lane shift amounts (static Python ints, normalized to [0, HW)).
    sh_pos = (shift_h * W) % HW                # +shift along H
    sh_neg = (HW - sh_pos) % HW                # -shift along H
    sw = shift_w                               # shift along W, in [0, W)
    w_pos_main, w_pos_fix = sw % HW, (sw - W) % HW          # +shift along W
    w_neg_main, w_neg_fix = (HW - sw) % HW, (W - sw) % HW   # -shift along W

    if nchunks <= 8:
        unroll = True
    else:  # keep the unroll factor a clean divisor of the trip count
        unroll = next(u for u in (8, 4, 2, 1) if nchunks % u == 0)

    def stream(roll_fn):
        # load -> roll -> store, chunk_rows sublanes at a time (short live
        # ranges); unrolled so the LLO scheduler overlaps loads and stores.
        if nchunks == 1:
            o_ref[...] = roll_fn(x_ref[...])
        else:
            def body(c, carry):
                r0 = pl.multiple_of(c * chunk_rows, chunk_rows)
                xc = x_ref[pl.ds(r0, chunk_rows), :]
                o_ref[pl.ds(r0, chunk_rows), :] = roll_fn(xc)
                return carry
            lax.fori_loop(0, nchunks, body, 0, unroll=unroll)

    @pl.when(g == 0)                           # group 1: +shift along H
    def _():
        stream(lambda xc: _lane_roll(xc, sh_pos))

    @pl.when(g == 1)                           # group 2: -shift along H
    def _():
        stream(lambda xc: _lane_roll(xc, sh_neg))

    if sw == 0:
        # W-shift is a no-op: groups 3 and 4 are plain copies.
        @pl.when(g >= 2)
        def _():
            stream(lambda xc: xc)
    else:
        @pl.when(g == 2)                       # group 3: +shift along W
        def _():
            # Hoisted column mask at full chunk shape: built once per
            # invocation, reused (same-shape select) by every chunk.
            col = jax.lax.broadcasted_iota(jnp.int32, (chunk_rows, HW), 1) % W
            mask = col < sw
            def roll_w_pos(xc):
                return jnp.where(mask, _lane_roll(xc, w_pos_fix),
                                 _lane_roll(xc, w_pos_main))
            stream(roll_w_pos)

        @pl.when(g == 3)                       # group 4: -shift along W
        def _():
            col = jax.lax.broadcasted_iota(jnp.int32, (chunk_rows, HW), 1) % W
            mask = col >= (W - sw)
            def roll_w_neg(xc):
                return jnp.where(mask, _lane_roll(xc, w_neg_fix),
                                 _lane_roll(xc, w_neg_main))
            stream(roll_w_neg)


def _vmem_budgets():
    """Generation-aware (max_block_bytes, vmem_limit_bytes)."""
    vmem_cap = 64 << 20                        # conservative default (v7x)
    try:
        info = pltpu.get_tpu_info()
        vmem_cap = int(getattr(info, "vmem_capacity_bytes", vmem_cap))
    except Exception:
        pass
    if vmem_cap >= (128 << 20):
        # v5e / v6e: 128 MiB VMEM.  Bigger blocks amortize per-step overhead;
        # explicit limit also covers v5e's small (16 MiB) scoped default.
        return 4 << 20, 48 << 20
    # v7x (64 MiB physical) or unknown: modest blocks, limit well under phys.
    return 2 << 20, min(32 << 20, vmem_cap // 2)


def _pick_channel_tile(cq, hw, itemsize, max_block_bytes, min_rows):
    """Channel tile tc: full cq if it fits the budget, otherwise the largest
    multiple of min_rows (>= 8, so the sublane rule holds) whose (tc, hw)
    block stays under max_block_bytes.  Never silently ignores the budget;
    only the irreducible min_rows tile may exceed it."""
    row_bytes = hw * itemsize
    if cq * row_bytes <= max_block_bytes:
        return cq
    tc = (max_block_bytes // row_bytes) // min_rows * min_rows
    tc = max(tc, min_rows)
    if tc >= cq:
        return cq
    return tc


def _pick_chunk_rows(tc, hw, itemsize, min_rows, target_bytes=48 << 10):
    """Rows per in-kernel streaming chunk: a multiple of the packed-sublane
    tile (8 f32 / 16 bf16 / 32 int8) dividing tc, with chunk bytes <= ~48 KiB
    so the W-roll path (3-4 live copies) never spills the register file."""
    if tc <= min_rows or tc % min_rows != 0:
        return tc
    best = min_rows
    for mult in range(1, tc // min_rows + 1):
        c = mult * min_rows
        if tc % c == 0 and c * hw * itemsize <= target_bytes:
            best = c
    return best


def shift_channel_mix(x, shift_size, *, max_block_bytes=None, chunk_rows=None,
                      vmem_limit_bytes=None):
    """Pallas implementation of Shift_channel_mix.forward. x: (B, C, H, W)."""
    B, C, H, W = x.shape
    assert C % 4 == 0, "channel count must be divisible by 4 (torch.chunk(4))"
    cq = C // 4
    HW = H * W

    itemsize = jnp.dtype(x.dtype).itemsize
    min_rows = max(8, 32 // itemsize)          # packed-sublane tile for dtype

    auto_block, auto_limit = _vmem_budgets()
    if max_block_bytes is None:
        max_block_bytes = auto_block
    if vmem_limit_bytes is None:
        vmem_limit_bytes = auto_limit

    tc = _pick_channel_tile(cq, HW, itemsize, max_block_bytes, min_rows)
    if chunk_rows is None:
        chunk_rows = _pick_chunk_rows(tc, HW, itemsize, min_rows)
    assert tc % chunk_rows == 0, "chunk_rows must divide the channel tile"

    # Lane-dense layout: (B, 4 groups, C//4 channels, H*W lanes).  Free
    # reshape for contiguous NCHW input; undone on the way out.
    xr = x.reshape(B, 4, cq, HW)

    kernel = functools.partial(
        _shift_channel_mix_kernel,
        W=W, HW=HW,
        shift_h=shift_size % H, shift_w=shift_size % W,
        chunk_rows=chunk_rows,
    )

    block = (None, None, tc, HW)
    out = pl.pallas_call(
        kernel,
        out_shape=jax.ShapeDtypeStruct((B, 4, cq, HW), x.dtype),
        grid=(B, 4, pl.cdiv(cq, tc)),          # ragged last tile if needed
        in_specs=[pl.BlockSpec(block, lambda b, g, t: (b, g, t, 0))],
        out_specs=pl.BlockSpec(block, lambda b, g, t: (b, g, t, 0)),
        compiler_params=pltpu.CompilerParams(
            dimension_semantics=("parallel", "parallel", "parallel"),
            vmem_limit_bytes=int(vmem_limit_bytes)),
    )(xr)
    return out.reshape(B, C, H, W)


def _reference(x, shift_size):
    # Pure-JAX reference (mirrors the PyTorch code 1:1).
    x1, x2, x3, x4 = jnp.split(x, 4, axis=1)
    x1 = jnp.roll(x1, shift_size, axis=2)
    x2 = jnp.roll(x2, -shift_size, axis=2)
    x3 = jnp.roll(x3, shift_size, axis=3)
    x4 = jnp.roll(x4, -shift_size, axis=3)
    return jnp.concatenate([x1, x2, x3, x4], axis=1)


if __name__ == "__main__":
    k1, k2, k3, k4 = jax.random.split(jax.random.PRNGKey(0), 4)

    # Case 1: small shape consistent with the module's usage (C % 4 == 0).
    x = jax.random.normal(k1, (2, 8, 16, 16), dtype=jnp.float32)
    out = jax.block_until_ready(shift_channel_mix(x, 2))
    ref = _reference(x, 2)
    assert out.shape == ref.shape and out.dtype == ref.dtype
    assert bool(jnp.array_equal(out, ref)), "case 1 mismatch vs reference"

    # Case 2: exercises the unrolled in-kernel streaming loop, a lane extent
    # that is not a multiple of 128 (H*W = 480) and a non-power-of-two W.
    x2 = jax.random.normal(k2, (1, 64, 24, 20), dtype=jnp.float32)
    out2 = jax.block_until_ready(shift_channel_mix(x2, 3, chunk_rows=8))
    ref2 = _reference(x2, 3)
    assert out2.shape == ref2.shape and out2.dtype == ref2.dtype
    assert bool(jnp.array_equal(out2, ref2)), "case 2 mismatch vs reference"

    # Case 3: forces the budget-safe tiling path with a ragged last channel
    # tile (cq = 10, tc = 8, grid uses pl.cdiv).
    x3 = jax.random.normal(k3, (2, 40, 8, 16), dtype=jnp.float32)
    out3 = jax.block_until_ready(
        shift_channel_mix(x3, 5, max_block_bytes=8 * 16 * 8 * 4))
    ref3 = _reference(x3, 5)
    assert out3.shape == ref3.shape and out3.dtype == ref3.dtype
    assert bool(jnp.array_equal(out3, ref3)), "case 3 mismatch vs reference"

    # Case 4: bf16 input (dtype-aware packed-sublane handling; exact since the
    # op is a pure permutation).
    x4 = jax.random.normal(k4, (2, 16, 8, 16), dtype=jnp.bfloat16)
    out4 = jax.block_until_ready(shift_channel_mix(x4, 1))
    ref4 = _reference(x4, 1)
    assert out4.shape == ref4.shape and out4.dtype == ref4.dtype
    assert bool(jnp.array_equal(out4, ref4)), "case 4 mismatch vs reference"

    print("KERNEL_OK")
</pallas_src>

<mosaic_0001>
module attributes {stable_mosaic.version = 11 : i64} {
  func.func @_shift_channel_mix_kernel(%arg0: i32, %arg1: i32, %arg2: i32, %arg3: memref<1x1x2x256xf32, #tpu.memory_space<vmem>>, %arg4: memref<1x1x2x256xf32, #tpu.memory_space<vmem>>) attributes {dimension_semantics = [#tpu.dimension_semantics<parallel>, #tpu.dimension_semantics<parallel>, #tpu.dimension_semantics<parallel>], iteration_bounds = array<i64: 2, 4, 1>, scalar_prefetch = 0 : i64, scratch_operands = 0 : i64, tpu.core_type = #tpu.core_type<tc>, window_params = [{transform_indices = @transform_0, window_bounds = array<i64: 1, 1, 2, 256>}, {transform_indices = @transform_1, window_bounds = array<i64: 1, 1, 2, 256>}]} {
    %c0_i32 = arith.constant 0 : i32
    %0 = arith.cmpi eq, %arg1, %c0_i32 : i32
    %1 = arith.extui %0 : i1 to i32
    %c0_i32_0 = arith.constant 0 : i32
    %2 = arith.cmpi ne, %1, %c0_i32_0 : i32
    scf.if %2 {
      %c0 = arith.constant 0 : index
      %c0_4 = arith.constant 0 : index
      %c0_5 = arith.constant 0 : index
      %c0_6 = arith.constant 0 : index
      %12 = vector.load %arg3[%c0, %c0_4, %c0_5, %c0_6] : memref<1x1x2x256xf32, #tpu.memory_space<vmem>>, vector<1x1x2x256xf32>
      %13 = vector.shape_cast %12 : vector<1x1x2x256xf32> to vector<2x256xf32>
      %c32_i32 = arith.constant 32 : i32
      %14 = tpu.dynamic_rotate %13 by %c32_i32 dim 1 : vector<2x256xf32>, i32 -> vector<2x256xf32>
      %c0_7 = arith.constant 0 : index
      %c0_8 = arith.constant 0 : index
      %c0_9 = arith.constant 0 : index
      %c0_10 = arith.constant 0 : index
      %15 = vector.load %arg4[%c0_7, %c0_8, %c0_9, %c0_10] : memref<1x1x2x256xf32, #tpu.memory_space<vmem>>, vector<1x1x2x256xf32>
      %16 = vector.shape_cast %15 : vector<1x1x2x256xf32> to vector<2x256xf32>
      %17 = vector.shape_cast %14 : vector<2x256xf32> to vector<1x1x2x256xf32>
      tpu.vector_store %arg4[%c0_7, %c0_8, %c0_9, %c0_10], %17 {strides = array<i32>} : memref<1x1x2x256xf32, #tpu.memory_space<vmem>>, vector<1x1x2x256xf32>,
    } else {
    }
    %c1_i32 = arith.constant 1 : i32
    %3 = arith.cmpi eq, %arg1, %c1_i32 : i32
    %4 = arith.extui %3 : i1 to i32
    %c0_i32_1 = arith.constant 0 : i32
    %5 = arith.cmpi ne, %4, %c0_i32_1 : i32
    scf.if %5 {
      %c0 = arith.constant 0 : index
      %c0_4 = arith.constant 0 : index
      %c0_5 = arith.constant 0 : index
      %c0_6 = arith.constant 0 : index
      %12 = vector.load %arg3[%c0, %c0_4, %c0_5, %c0_6] : memref<1x1x2x256xf32, #tpu.memory_space<vmem>>, vector<1x1x2x256xf32>
      %13 = vector.shape_cast %12 : vector<1x1x2x256xf32> to vector<2x256xf32>
      %c224_i32 = arith.constant 224 : i32
      %14 = tpu.dynamic_rotate %13 by %c224_i32 dim 1 : vector<2x256xf32>, i32 -> vector<2x256xf32>
      %c0_7 = arith.constant 0 : index
      %c0_8 = arith.constant 0 : index
      %c0_9 = arith.constant 0 : index
      %c0_10 = arith.constant 0 : index
      %15 = vector.load %arg4[%c0_7, %c0_8, %c0_9, %c0_10] : memref<1x1x2x256xf32, #tpu.memory_space<vmem>>, vector<1x1x2x256xf32>
      %16 = vector.shape_cast %15 : vector<1x1x2x256xf32> to vector<2x256xf32>
      %17 = vector.shape_cast %14 : vector<2x256xf32> to vector<1x1x2x256xf32>
      tpu.vector_store %arg4[%c0_7, %c0_8, %c0_9, %c0_10], %17 {strides = array<i32>} : memref<1x1x2x256xf32, #tpu.memory_space<vmem>>, vector<1x1x2x256xf32>,
    } else {
    }
    %c2_i32 = arith.constant 2 : i32
    %6 = arith.cmpi eq, %arg1, %c2_i32 : i32
    %7 = arith.extui %6 : i1 to i32
    %c0_i32_2 = arith.constant 0 : i32
    %8 = arith.cmpi ne, %7, %c0_i32_2 : i32
    scf.if %8 {
      %12 = tpu.iota {dimensions = array<i32: 1>} : vector<2x256xi32>
      %c16_i32 = arith.constant 16 : i32
      %c0_i32_4 = arith.constant 0 : i32
      %13 = arith.cmpi eq, %c16_i32, %c0_i32_4 : i32
      %c1_i32_5 = arith.constant 1 : i32
      %14 = arith.select %13, %c1_i32_5, %c16_i32 : i32
      %15 = vector.broadcast %14 : i32 to vector<2x256xi32>
      %16 = arith.remsi %12, %15 : vector<2x256xi32>
      %c0_i32_6 = arith.constant 0 : i32
      %17 = vector.broadcast %c0_i32_6 : i32 to vector<2x256xi32>
      %18 = arith.cmpi ne, %16, %17 : vector<2x256xi32>
      %c0_i32_7 = arith.constant 0 : i32
      %19 = vector.broadcast %c0_i32_7 : i32 to vector<2x256xi32>
      %20 = arith.cmpi slt, %16, %19 : vector<2x256xi32>
      %c0_i32_8 = arith.constant 0 : i32
      %21 = arith.cmpi slt, %14, %c0_i32_8 : i32
      %22 = vector.broadcast %21 : i1 to vector<2x256xi1>
      %23 = vector.broadcast %22 : vector<2x256xi1> to vector<2x256xi1>
      %24 = arith.xori %20, %23 : vector<2x256xi1>
      %25 = arith.andi %24, %18 : vector<2x256xi1>
      %26 = vector.broadcast %14 : i32 to vector<2x256xi32>
      %27 = arith.addi %16, %26 : vector<2x256xi32>
      %28 = arith.select %25, %27, %16 : vector<2x256xi1>, vector<2x256xi32>
      %c2_i32_9 = arith.constant 2 : i32
      %29 = vector.broadcast %c2_i32_9 : i32 to vector<2x256xi32>
      %30 = arith.cmpi slt, %28, %29 : vector<2x256xi32>
      %c0 = arith.constant 0 : index
      %c0_10 = arith.constant 0 : index
      %c0_11 = arith.constant 0 : index
      %c0_12 = arith.constant 0 : index
      %31 = vector.load %arg3[%c0, %c0_10, %c0_11, %c0_12] : memref<1x1x2x256xf32, #tpu.memory_space<vmem>>, vector<1x1x2x256xf32>
      %32 = vector.shape_cast %31 : vector<1x1x2x256xf32> to vector<2x256xf32>
      %c242_i32 = arith.constant 242 : i32
      %33 = tpu.dynamic_rotate %32 by %c242_i32 dim 1 : vector<2x256xf32>, i32 -> vector<2x256xf32>
      %c2_i32_13 = arith.constant 2 : i32
      %34 = tpu.dynamic_rotate %32 by %c2_i32_13 dim 1 : vector<2x256xf32>, i32 -> vector<2x256xf32>
      %35 = arith.select %30, %33, %34 : vector<2x256xi1>, vector<2x256xf32>
      %c0_14 = arith.constant 0 : index
      %c0_15 = arith.constant 0 : index
      %c0_16 = arith.constant 0 : index
      %c0_17 = arith.constant 0 : index
      %36 = vector.load %arg4[%c0_14, %c0_15, %c0_16, %c0_17] : memref<1x1x2x256xf32, #tpu.memory_space<vmem>>, vector<1x1x2x256xf32>
      %37 = vector.shape_cast %36 : vector<1x1x2x256xf32> to vector<2x256xf32>
      %38 = vector.shape_cast %35 : vector<2x256xf32> to vector<1x1x2x256xf32>
      tpu.vector_store %arg4[%c0_14, %c0_15, %c0_16, %c0_17], %38 {strides = array<i32>} : memref<1x1x2x256xf32, #tpu.memory_space<vmem>>, vector<1x1x2x256xf32>,
    } else {
    }
    %c3_i32 = arith.constant 3 : i32
    %9 = arith.cmpi eq, %arg1, %c3_i32 : i32
    %10 = arith.extui %9 : i1 to i32
    %c0_i32_3 = arith.constant 0 : i32
    %11 = arith.cmpi ne, %10, %c0_i32_3 : i32
    scf.if %11 {
      %12 = tpu.iota {dimensions = array<i32: 1>} : vector<2x256xi32>
      %c16_i32 = arith.constant 16 : i32
      %c0_i32_4 = arith.constant 0 : i32
      %13 = arith.cmpi eq, %c16_i32, %c0_i32_4 : i32
      %c1_i32_5 = arith.constant 1 : i32
      %14 = arith.select %13, %c1_i32_5, %c16_i32 : i32
      %15 = vector.broadcast %14 : i32 to vector<2x256xi32>
      %16 = arith.remsi %12, %15 : vector<2x256xi32>
      %c0_i32_6 = arith.constant 0 : i32
      %17 = vector.broadcast %c0_i32_6 : i32 to vector<2x256xi32>
      %18 = arith.cmpi ne, %16, %17 : vector<2x256xi32>
      %c0_i32_7 = arith.constant 0 : i32
      %19 = vector.broadcast %c0_i32_7 : i32 to vector<2x256xi32>
      %20 = arith.cmpi slt, %16, %19 : vector<2x256xi32>
      %c0_i32_8 = arith.constant 0 : i32
      %21 = arith.cmpi slt, %14, %c0_i32_8 : i32
      %22 = vector.broadcast %21 : i1 to vector<2x256xi1>
      %23 = vector.broadcast %22 : vector<2x256xi1> to vector<2x256xi1>
      %24 = arith.xori %20, %23 : vector<2x256xi1>
      %25 = arith.andi %24, %18 : vector<2x256xi1>
      %26 = vector.broadcast %14 : i32 to vector<2x256xi32>
      %27 = arith.addi %16, %26 : vector<2x256xi32>
      %28 = arith.select %25, %27, %16 : vector<2x256xi1>, vector<2x256xi32>
      %c14_i32 = arith.constant 14 : i32
      %29 = vector.broadcast %c14_i32 : i32 to vector<2x256xi32>
      %30 = arith.cmpi sge, %28, %29 : vector<2x256xi32>
      %c0 = arith.constant 0 : index
      %c0_9 = arith.constant 0 : index
      %c0_10 = arith.constant 0 : index
      %c0_11 = arith.constant 0 : index
      %31 = vector.load %arg3[%c0, %c0_9, %c0_10, %c0_11] : memref<1x1x2x256xf32, #tpu.memory_space<vmem>>, vector<1x1x2x256xf32>
      %32 = vector.shape_cast %31 : vector<1x1x2x256xf32> to vector<2x256xf32>
      %c14_i32_12 = arith.constant 14 : i32
      %33 = tpu.dynamic_rotate %32 by %c14_i32_12 dim 1 : vector<2x256xf32>, i32 -> vector<2x256xf32>
      %c254_i32 = arith.constant 254 : i32
      %34 = tpu.dynamic_rotate %32 by %c254_i32 dim 1 : vector<2x256xf32>, i32 -> vector<2x256xf32>
      %35 = arith.select %30, %33, %34 : vector<2x256xi1>, vector<2x256xf32>
      %c0_13 = arith.constant 0 : index
      %c0_14 = arith.constant 0 : index
      %c0_15 = arith.constant 0 : index
      %c0_16 = arith.constant 0 : index
      %36 = vector.load %arg4[%c0_13, %c0_14, %c0_15, %c0_16] : memref<1x1x2x256xf32, #tpu.memory_space<vmem>>, vector<1x1x2x256xf32>
      %37 = vector.shape_cast %36 : vector<1x1x2x256xf32> to vector<2x256xf32>
      %38 = vector.shape_cast %35 : vector<2x256xf32> to vector<1x1x2x256xf32>
      tpu.vector_store %arg4[%c0_13, %c0_14, %c0_15, %c0_16], %38 {strides = array<i32>} : memref<1x1x2x256xf32, #tpu.memory_space<vmem>>, vector<1x1x2x256xf32>,
    } else {
    }
    return
  }
  func.func @transform_0(%arg0: i32, %arg1: i32, %arg2: i32) -> (i32, i32, i32, i32) {
    %c0_i32 = arith.constant 0 : i32
    %c0_i32_0 = arith.constant 0 : i32
    return %arg0, %arg1, %arg2, %c0_i32 : i32, i32, i32, i32
  }
  func.func @transform_1(%arg0: i32, %arg1: i32, %arg2: i32) -> (i32, i32, i32, i32) {
    %c0_i32 = arith.constant 0 : i32
    %c0_i32_0 = arith.constant 0 : i32
    return %arg0, %arg1, %arg2, %c0_i32 : i32, i32, i32, i32
  }
}

</mosaic_0001>

<bundles_post_ra>
// kernel: tpu_custom_call.1
= control target key start
LH: loop header
LB: loop body
LE: loop exit
PB: predicated region body
PF: predicated region fallthrough
CT: control target
= control target key end

     0   :  { %6 = vsyncpa [#allocation3], 0  ;;  %s927_s0 = inlined_call_operand.hbm [shape: f32[2,4,2,256], index: 0, kind: input, shape index: {}]   ;;  %s928_s1 = inlined_call_operand.hbm [shape: f32[2,4,2,256], index: 1, kind: output, shape index: {}]  }
   0x1   :  { %8 = vsyncpa [#allocation3 + $0x1], 0 }
   0x2   :  { %9 = vsyncpa [#allocation4], 0 }
   0x3   :  { %11 = vsyncpa [#allocation4 + $0x1], 0  ;;  %s754_s6 = smov 0   ;;  %s756_s7 = smov 0  }
   0x4   :  { %s758_s8 = smov 0   ;;  %s760_s9 = smov 0  }
   0x5   :  { %s762_s10 = smov 0   ;;  %s764_s11 = smov 0  }
   0x6   :  { %s766_s12 = smov 0   ;;  %s768_s13 = smov 0  }
   0x7 LB: > { %s497_s14 = sadd.s32 4294967295, %s734_s13   ;;  %s498_s15 = sadd.s32 4294967294, %s734_s13   ;;  %s734_s13 = sphi %s768_s13, %s17_s13   ;;  %s730_s12 = sphi %s766_s12, %s941_s12   ;;  %s726_s11 = sphi %s764_s11, %s940_s11   ;;  %s722_s10 = sphi %s762_s10, %s939_s10   ;;  %s718_s9 = sphi %s760_s9, %s938_s9   ;;  %s714_s8 = sphi %s758_s8, %s937_s8   ;;  %s710_s7 = sphi %s756_s7, %s936_s7   ;;  %s706_s6 = sphi %s754_s6, %s935_s6  }
   0x8   : > { %s32_s16 = sadd.s32 1, %s726_s11  ;;  %s36_s17 = sadd.s32 1, %s730_s12 }
   0x9   : > { %p34_p0 = scmp.ge.s32.totalorder %s32_s16, 4  ;;  %s47_s18 = sadd.s32 1, %s714_s8 }
   0xa   : > { %p54_p1 = scmp.ne.s32.totalorder %s714_s8, %s710_s7  ;;  %p55_p2 = scmp.eq.s32.totalorder %s734_s13, 0 }
   0xb   : > { %s943_s16 = smov (%p34_p0, %s32_s16), 0  ;;  %s945_s17 = smov (!%p34_p0, %s36_s17), %s730_s12 }
   0xc   : > { %s41_s19 = ssub.s32 %s726_s11, %s943_s16  ;;  %p807_p3 = por %p55_p2, %p54_p1 }
   0xd   : > { %p38_p4 = scmp.ge.s32.totalorder %s945_s17, 2  ;;  %p60_p5 = scmp.ne.s32.totalorder %s710_s7, %s706_s6 }
   0xe   : > { %p61_p6 = scmp.eq.s32.totalorder %s497_s14, 0  ;;  %p88_p7 = scmp.eq.s32.totalorder %s497_s14, 7 }
   0xf   : > { %s947_s17 = smov (%p38_p4, %s945_s17), 0  ;;  %p94_p10 = scmp.eq.s32.totalorder %s498_s15, 7 }
  0x10   : > { %p815_p8 = por %p61_p6, %p60_p5  ;;  %p819_p9 = por %p88_p7, %p54_p1 }
  0x11   : > { %s40_s23 = ssub.s32 %s730_s12, %s947_s17  ;;  %p825_p12 = por %p94_p10, %p60_p5 }
  0x12   : > { %s42_s24 = sor.u32 %s41_s19, %s40_s23  ;;  %p538_p13 = scmp.lt.s32.totalorder %s734_s13, 8 }
  0x13   : > { %p45_p11 = scmp.eq.s32.totalorder %s42_s24, 0  ;;  %s114_s26 = sand.u32 1, %s714_s8  }
  0x14   : > { %s932_s25 = scalar_select %p825_p12, 1, 0 }
  0x15   : > { %s832_s27 = scalar_select %p45_p11, %s714_s8, %s47_s18  }
  0x16   : > { %s501_s28 = sshll.u32 %s114_s26, 2  ;;  %s502_s29 = sshll.u32 %s726_s11, 1 }
  0x17   : > { %s503_s30 = sshll.u32 %s730_s12, 3  ;;  %s118_s2 = scalar_lea.vmem [#allocation2], %s501_s28 }
  0x18   : > { %s130_s3 = sshll.u32 %s118_s2, 4  ;;  %s126_s4 = sadd.s32 %s503_s30, %s502_s29  ;;  %s131_s3 = int_to_ptr.vmem [resolvable:$true] %s130_s3 }
  0x19   : > { %s504_s5 = sshll.u32 %s126_s4, 5  ;;  %p838_p0 = pnand %p538_p13, %p807_p3 }
  0x1a   : > { %s128_s23 = scalar_lea.hbm %s927_s0, %s504_s5  ;;  %p505_p1 = scmp.ge.s32.totalorder %s734_s13, 1 }
  0x1b   : > { %p135_p2 = scmp.lt.s32.totalorder %s734_s13, 9  ;;  %s115_s18 = scalar_lea.sflag [#allocation3], %s114_s26 }
  0x1c   : > { %p612_p4 = pneg %p838_p0  ;;  %s623_s24 = scalar_lea.vmem %s131_s3, 64 }
  0x1d   : > { %p624_p5 = scmp.ne.s32.totalorder %s131_s3, %s623_s24  ;;  %s736_s28 = smov [#allocation2]  }
  0x1e   : > { %s628_s20 = sshll.u32 %s736_s28, 4  ;;  %s629_s20 = int_to_ptr.vmem [resolvable:$false] %s628_s20 }
  0x1f   : > { %p626_p6 = pnand %p624_p5, %p612_p4  ;;  %s630_s29 = scalar_lea.vmem %s629_s20, 128 }
  0x20   : > { %p631_p3 = scmp.lt.s32.totalorder %s131_s3, %s629_s20  ;;  %p632_p10 = scmp.lt.s32.totalorder %s630_s29, %s623_s24 }
  0x21   : > { %p627_p7 = pneg %p626_p6 }
  0x22   : > { %p633_p11 = por %p632_p10, %p631_p3 }
  0x24   : > { %p634_p13 = pnand %p633_p11, %p627_p7 }
  0x26   : > { %637 = shalt.err (!%p634_p13)
}
  0x27   : > { %533 = dma.hbm_to_vmem [thread:$0]  (!%p838_p0), %s128_s23, 64, %s131_s3, %s115_s18  }
  0x28   : > { %p136_p12 = pnand %p505_p1, %p135_p2 }
  0x29   : > { %s856_s26 = sand.u32 (!%p136_p12), 1, %s710_s7  }
  0x2a   : > { %139 = sbr.rel (%p136_p12) target bundleno = 599 (0x257), region = 24  ;;  %s506_s30 = sshll.u32 (!%p136_p12), %s856_s26, 2 }
  0x2b   : > { %s142_s2 = scalar_lea.sflag (!%p136_p12), [#allocation3], %s856_s26  ;;  %s860_s4 = scalar_lea.vmem (!%p136_p12), [#allocation2], %s506_s30 }
  0x2f   : > { %697 = dma.done.wait (%p815_p8), %s142_s2, 64  }
  0x30   : > { %699 = vsyncadd (%p815_p8), %s142_s2, 4294967232  ;;  %s866_s3 = scalar_lea.vmem [#allocation5], %s506_s30  ;;  %p508_p0 = scmp.ne.s32.totalorder %s718_s9, 0 }
  0x31   : > { %s737_s5 = smov (!%p508_p0), 32  }
  0x32   : > { %167 = sbr.rel (%p508_p0) target bundleno = 179 (0xb3), region = 32 }
  0x37   : > { %v509_v0 = vld.sshfl [vmem:[%s860_s4] sm:$0x33 pattern:$0x76325410]  ;;  %v184_v2 = vlaneseq }
  0x38   : > { %180 = vrot.lane.b32.xlu0 %v509_v0, %s737_s5  ;;  %v177_v1 = vcombine.high %v509_v0, %v509_v0 }
  0x39   : > { %v185_v3 = vand.u32 127, %v184_v2 }
  0x3b   : > { %vm186_vm0 = vcmp.lt.s32.totalorder %v185_v3, 32 }
  0x3c   : > { %182 = vrot.lane.b32.xlu0 %v177_v1, %s737_s5 }
  0xaa   : > { %v181_v4 = vpop.permute.xlu0 %180 }
  0xae   : > { %v183_v5 = vpop.permute.xlu0 %182 }
  0xaf   : > { %v187_v6 = vsel %vm186_vm0, %v181_v4, %v183_v5  ;;  %v188_v7 = vsel %vm186_vm0, %v183_v5, %v181_v4 }
  0xb0   : > { %v191_v8 = vcombine.low %v188_v7, %v187_v6 }
  0xb2   : > { %510 = vst.sshfl [vmem:[%s866_s3] sm:$0x33 pattern:$0x76325410] %v191_v8 }
  0xb3 PF: > { %p511_p8 = scmp.ne.s32.totalorder %s718_s9, 1 }
  0xb4   : > { %s738_s21 = smov (!%p511_p8), 96  }
  0xb5   : > { %204 = sbr.rel (%p511_p8) target bundleno = 310 (0x136), region = 36 }
  0xba   : > { %v512_v9 = vld.sshfl [vmem:[%s860_s4] sm:$0x33 pattern:$0x76325410]  ;;  %v221_v11 = vlaneseq }
  0xbb   : > { %217 = vrot.lane.b32.xlu0 %v512_v9, %s738_s21  ;;  %v214_v10 = vcombine.high %v512_v9, %v512_v9 }
  0xbc   : > { %v222_v12 = vand.u32 127, %v221_v11 }
  0xbe   : > { %vm223_vm1 = vcmp.lt.s32.totalorder %v222_v12, 96 }
  0xbf   : > { %219 = vrot.lane.b32.xlu0 %v214_v10, %s738_s21 }
 0x12d   : > { %v218_v13 = vpop.permute.xlu0 %217 }
 0x131   : > { %v220_v14 = vpop.permute.xlu0 %219 }
 0x132   : > { %v224_v15 = vsel %vm223_vm1, %v218_v13, %v220_v14  ;;  %v225_v16 = vsel %vm223_vm1, %v220_v14, %v218_v13 }
 0x133   : > { %v228_v17 = vcombine.low %v224_v15, %v225_v16 }
 0x135   : > { %513 = vst.sshfl [vmem:[%s866_s3] sm:$0x33 pattern:$0x76325410] %v228_v17 }
 0x136 PF: > { %p514_p12 = scmp.ne.s32.totalorder %s718_s9, 2 }
 0x137   : > { %s739_s14 = smov (!%p514_p12), 2   ;;  %s740_s15 = smov (!%p514_p12), 114  }
 0x138   : > { %241 = sbr.rel (%p514_p12) target bundleno = 442 (0x1ba), region = 40 }
 0x13d   : > { %v515_v18 = vld.sshfl [vmem:[%s860_s4] sm:$0x33 pattern:$0x76325410]  ;;  %v242_v20 = vlaneseq }
 0x13e   : > { %290 = vrot.lane.b32.xlu1 %v515_v18, %s739_s14  ;;  %283 = vrot.lane.b32.xlu0 %v515_v18, %s740_s15  ;;  %v280_v19 = vcombine.high %v515_v18, %v515_v18 }
 0x13f   : > { %v243_v21 = vand.u32 127, %v242_v20 }
 0x141   : > { %v244_v22 = vadd.s32 128, %v243_v21  ;;  %v249_v23 = vand.u32 15, %v243_v21  ;;  %vm294_vm2 = vcmp.lt.s32.totalorder %v243_v21, 2  ;;  %vm287_vm3 = vcmp.lt.s32.totalorder %v243_v21, 114 }
 0x142   : > { %292 = vrot.lane.b32.xlu1 %v280_v19, %s739_s14  ;;  %285 = vrot.lane.b32.xlu0 %v280_v19, %s740_s15 }
 0x143   : > { %v256_v24 = vand.u32 15, %v244_v22  ;;  %vm269_vm4 = vcmp.lt.s32.totalorder %v249_v23, 2 }
 0x145   : > { %vm270_vm5 = vcmp.lt.s32.totalorder %v256_v24, 2 }
 0x1b0   : > { %v291_v25 = vpop.permute.xlu1 %290  ;;  %v284_v26 = vpop.permute.xlu0 %283 }
 0x1b4   : > { %v293_v27 = vpop.permute.xlu1 %292  ;;  %v286_v28 = vpop.permute.xlu0 %285 }
 0x1b5   : > { %v295_v29 = vsel %vm294_vm2, %v291_v25, %v293_v27  ;;  %v296_v30 = vsel %vm294_vm2, %v293_v27, %v291_v25  ;;  %v288_v31 = vsel %vm287_vm3, %v284_v26, %v286_v28  ;;  %v289_v32 = vsel %vm287_vm3, %v286_v28, %v284_v26 }
 0x1b6   : > { %v297_v33 = vsel %vm269_vm4, %v288_v31, %v296_v30  ;;  %v298_v34 = vsel %vm270_vm5, %v289_v32, %v295_v29 }
 0x1b7   : > { %v301_v35 = vcombine.low %v297_v33, %v298_v34 }
 0x1b9   : > { %516 = vst.sshfl [vmem:[%s866_s3] sm:$0x33 pattern:$0x76325410] %v301_v35 }
 0x1ba PF: > { %p517_p1 = scmp.ne.s32.totalorder %s718_s9, 3 }
 0x1bb   : > { %s741_s19 = smov (!%p517_p1), 126   ;;  %s742_s23 = smov (!%p517_p1), 14  }
 0x1bc   : > { %314 = sbr.rel (%p517_p1) target bundleno = 574 (0x23e), region = 44 }
 0x1c1   : > { %v518_v36 = vld.sshfl [vmem:[%s860_s4] sm:$0x33 pattern:$0x76325410]  ;;  %v315_v38 = vlaneseq }
 0x1c2   : > { %363 = vrot.lane.b32.xlu1 %v518_v36, %s741_s19  ;;  %356 = vrot.lane.b32.xlu0 %v518_v36, %s742_s23  ;;  %v353_v37 = vcombine.high %v518_v36, %v518_v36 }
 0x1c3   : > { %v316_v39 = vand.u32 127, %v315_v38 }
 0x1c5   : > { %v317_v40 = vadd.s32 128, %v316_v39  ;;  %v322_v41 = vand.u32 15, %v316_v39  ;;  %vm367_vm6 = vcmp.lt.s32.totalorder %v316_v39, 126  ;;  %vm360_vm7 = vcmp.lt.s32.totalorder %v316_v39, 14 }
 0x1c6   : > { %365 = vrot.lane.b32.xlu1 %v353_v37, %s741_s19  ;;  %358 = vrot.lane.b32.xlu0 %v353_v37, %s742_s23 }
 0x1c7   : > { %v329_v42 = vand.u32 15, %v317_v40  ;;  %vm342_vm8 = vcmp.ge.s32.totalorder %v322_v41, 14 }
 0x1c9   : > { %vm343_vm9 = vcmp.ge.s32.totalorder %v329_v42, 14 }
 0x234   : > { %v364_v43 = vpop.permute.xlu1 %363  ;;  %v357_v44 = vpop.permute.xlu0 %356 }
 0x238   : > { %v366_v45 = vpop.permute.xlu1 %365  ;;  %v359_v46 = vpop.permute.xlu0 %358 }
 0x239   : > { %v368_v47 = vsel %vm367_vm6, %v364_v43, %v366_v45  ;;  %v369_v48 = vsel %vm367_vm6, %v366_v45, %v364_v43  ;;  %v361_v49 = vsel %vm360_vm7, %v357_v44, %v359_v46  ;;  %v362_v50 = vsel %vm360_vm7, %v359_v46, %v357_v44 }
 0x23a   : > { %v370_v51 = vsel %vm342_vm8, %v362_v50, %v368_v47  ;;  %v371_v52 = vsel %vm343_vm9, %v361_v49, %v369_v48 }
 0x23b   : > { %v374_v53 = vcombine.low %v370_v51, %v371_v52 }
 0x23d   : > { %519 = vst.sshfl [vmem:[%s866_s3] sm:$0x33 pattern:$0x76325410] %v374_v53 }
 0x23e PF: > { %s521_s18 = sshll.u32 %s718_s9, 1  ;;  %s522_s24 = sshll.u32 %s722_s10, 3 }
 0x23f   : > { %s403_s28 = sshll.u32 %s866_s3, 4  ;;  %s399_s20 = sadd.s32 %s522_s24, %s521_s18  ;;  %s404_s28 = int_to_ptr.vmem [resolvable:$true] %s403_s28 }
 0x240   : > { %s523_s29 = sshll.u32 %s399_s20, 5  ;;  %s385_s5 = scalar_lea.sflag [#allocation4], %s856_s26 }
 0x241   : > { %s401_s4 = scalar_lea.hbm %s928_s1, %s523_s29  ;;  %s638_s21 = scalar_lea.vmem %s404_s28, 64 }
 0x242   : > { %p639_p2 = scmp.ne.s32.totalorder %s404_s28, %s638_s21  ;;  %s743_s14 = smov [#allocation5]  }
 0x243   : > { %s642_s15 = sshll.u32 %s743_s14, 4  ;;  %s643_s15 = int_to_ptr.vmem [resolvable:$false] %s642_s15 }
 0x244   : > { %p640_p4 = pnand %p639_p2, %p819_p9  ;;  %s644_s19 = scalar_lea.vmem %s643_s15, 128 }
 0x245   : > { %p645_p6 = scmp.lt.s32.totalorder %s404_s28, %s643_s15  ;;  %p646_p7 = scmp.lt.s32.totalorder %s644_s19, %s638_s21 }
 0x246   : > { %p641_p5 = pneg %p640_p4 }
 0x247   : > { %p647_p3 = por %p646_p7, %p645_p6 }
 0x249   : > { %p648_p10 = pnand %p647_p3, %p641_p5 }
 0x24b   : > { %651 = shalt.err (!%p648_p10)
}
 0x24c   : > { %s652_s9 = scalar_lea.hbm %s401_s4, 64  ;;  %s656_s3 = scalar_lea.hbm %s928_s1, 512 }
 0x24d   : > { %p653_p11 = scmp.ne.s32.totalorder %s401_s4, %s652_s9  ;;  %p657_p8 = scmp.lt.s32.totalorder %s401_s4, %s928_s1 }
 0x24e   : > { %p658_p12 = scmp.lt.s32.totalorder %s656_s3, %s652_s9 }
 0x24f   : > { %p654_p13 = pnand %p653_p11, %p819_p9 }
 0x250   : > { %p659_p1 = por %p658_p12, %p657_p8 }
 0x251   : > { %p655_p0 = pneg %p654_p13 }
 0x253   : > { %p660_p2 = pnand %p659_p1, %p655_p0 }
 0x255   : > { %663 = shalt.err (!%p660_p2)
}
 0x256   : > { %528 = dma.vmem_to_hbm [thread:$0]  (%p819_p9), %s404_s28, 64, %s401_s4, %s385_s5  }
 0x257 PF: > { %p539_p4 = scmp.ge.s32.totalorder %s734_s13, 2  ;;  %s415_s24 = sand.u32 1, %s706_s6  }
 0x258   : > { %p934_p5 = scmp.ne.s32.totalorder %s932_s25, 0  ;;  %s416_s20 = scalar_lea.sflag [#allocation4], %s415_s24 }
 0x25a   : > { %p535_p6 = pnand %p539_p4, %p934_p5 }
 0x25c   : > { %p536_p7 = pneg %p535_p6 }
 0x25e   : > { %701 = dma.done.wait (%p536_p7), %s416_s20, 64  }
 0x25f   : > { %703 = vsyncadd (%p536_p7), %s416_s20, 4294967232  ;;  %s17_s13 = sadd.s32 1, %s734_s13   ;;  %s935_s6 = smov %s710_s7 }
 0x260   : > { %p14_p3 = scmp.ge.s32.totalorder %s17_s13, 10   ;;  %s936_s7 = smov %s714_s8 }
 0x261   : > { %s937_s8 = smov %s832_s27  ;;  %s938_s9 = smov %s726_s11 }
 0x262   : > { %s939_s10 = smov %s730_s12  ;;  %s940_s11 = smov %s943_s16 }
 0x263   : > { %s941_s12 = smov %s947_s17  ;;  %16 = sbr.rel (!%p14_p3) target bundleno = 7 (0x7), region = 85 }
 0x268   :  { %421 = vsyncpa [#allocation3], 1 }
 0x269   :  { %423 = vsyncpa [#allocation3 + $0x1], 1 }
 0x26a   :  { %424 = vsyncpa [#allocation4], 1 }
 0x26b   :  { %426 = vsyncpa [#allocation4 + $0x1], 1 }

</bundles_post_ra>
